<compile_context>
chip_gen: v7x
topology: tpu7x:2x2x1
jax: 0.10.0
libtpu: 0.0.40
codegen_flags: <defaults>
</compile_context>

<pallas_src>
import jax
import jax.numpy as jnp
from jax import lax
from jax.experimental import pallas as pl
from jax.experimental.pallas import tpu as pltpu


def _round_up(n, m):
    return ((n + m - 1) // m) * m


def _make_lstm_kernel(*, H, t_chunk, T_total, whole_slab, need_mask, unroll):
    """Build the kernel closed over static shape/config parameters."""

    def sigm(v):
        # sigmoid via tanh: one EUP push instead of exp + reciprocal.
        return 0.5 * jnp.tanh(0.5 * v) + 0.5

    def kernel(xg_ref, whh_ref, h_out_ref, h_sc, c_sc):
        # xg_ref:  (t_chunk, b_tile, L)  precomputed gate inputs (bf16 or f32)
        # whh_ref: (H, L)                W_hh^T, gate-packed (bf16 or f32), resident
        # h_out:   (b_tile, H)           last hidden state (written on the final time chunk)
        # h_sc/c_sc: (b_tile, H) f32     carried LSTM state (persist across time chunks)
        t_step = pl.program_id(1)

        @pl.when(t_step == 0)
        def _():
            h_sc[...] = jnp.zeros_like(h_sc)
            c_sc[...] = jnp.zeros_like(c_sc)

        # Small resident weight; for very large H feed jnp.dot from whh_ref directly
        # instead of materializing it in vregs (spill risk).
        whh = whh_ref[...]

        def body(t, carry):
            h, c = carry
            # Only recurrent dot in the loop; f32 accumulation on the MXU.
            gates = xg_ref[t].astype(jnp.float32) + jnp.dot(
                h.astype(whh.dtype), whh, preferred_element_type=jnp.float32)
            if whole_slab:
                # 4H <= 128: the whole gate slab is one vreg column -> compute the
                # nonlinearities once on the full slab, then take lane slices.
                sig = sigm(gates)
                th = jnp.tanh(gates)
                i_g = sig[:, 0:H]
                f_g = sig[:, H:2 * H]
                g_g = th[:, 2 * H:3 * H]
                o_g = sig[:, 3 * H:4 * H]
            else:
                i_g = sigm(gates[:, 0:H])
                f_g = sigm(gates[:, H:2 * H])
                g_g = jnp.tanh(gates[:, 2 * H:3 * H])
                o_g = sigm(gates[:, 3 * H:4 * H])
            c_new = f_g * c + i_g * g_g
            h_new = o_g * jnp.tanh(c_new)
            if need_mask:
                # Padded time steps (T_pad > T): carry passes through unchanged.
                valid = (t_step * t_chunk + t) < T_total
                h_new = jnp.where(valid, h_new, h)
                c_new = jnp.where(valid, c_new, c)
            return h_new, c_new

        h, c = lax.fori_loop(0, t_chunk, body, (h_sc[...], c_sc[...]),
                             unroll=unroll)
        h_sc[...] = h
        c_sc[...] = c

        @pl.when(t_step == pl.num_programs(1) - 1)
        def _():
            h_out_ref[...] = h.astype(h_out_ref.dtype)

    return kernel


def lstm_model_forward(x, params, *, t_chunk=None, compute_dtype=jnp.bfloat16):
    """x: [B, T, I] float32. Returns [B, output_size] (matches LSTMModel.forward).

    compute_dtype controls the dtype of the streamed gate inputs (xg) and the resident
    recurrent weight W_hh^T fed to the MXU; accumulation / elementwise math stays f32.
    """
    B, T, I = x.shape
    w_ih, w_hh, b_ih, b_hh, w_fc, b_fc = (
        params["w_ih"], params["w_hh"], params["b_ih"], params["b_hh"],
        params["w_fc"], params["b_fc"])
    H = w_hh.shape[1]

    L = _round_up(4 * H, 128)          # packed gate slab width (lane granule)
    whole_slab = (4 * H <= 128)        # single-vreg slab -> whole-slab nonlinearities

    # Batch tiling: >= 2 parallel batch tiles when B_pad >= 16 (lets v7x's 2 TCs split B).
    B_pad = _round_up(B, 8)
    n_btiles = 1 if B_pad <= 8 else 2
    b_tile = _round_up(-(-B_pad // n_btiles), 8)
    B_pad2 = b_tile * n_btiles

    # Time chunking: amortize per-grid-step overhead, cap double-buffered xg chunk ~4 MiB/buf
    # so xg(2 bufs) + whh + h/c scratch stays far below v7x's 32 MiB scoped VMEM default.
    itemsize = jnp.dtype(compute_dtype).itemsize
    if t_chunk is None:
        cap = max(1, (4 << 20) // (b_tile * L * itemsize))
        t_chunk = max(1, min(T, 64, cap))
    n_tchunks = -(-T // t_chunk)
    T_pad = n_tchunks * t_chunk
    need_mask = (T_pad != T)
    unroll = min(t_chunk, 8)           # bounded unroll: LLO visibility without vreg spills

    # ---- Hoisted input projection, emitted directly in kernel-ready (T, B_pad, L) layout ----
    bias = b_ih + b_hh                                         # (4H,)
    xg = jnp.einsum('bti,gi->tbg', x, w_ih) + bias             # (T, B, 4H), time-major
    xg = jnp.pad(xg, ((0, T_pad - T), (0, B_pad2 - B), (0, L - 4 * H)))
    xg = xg.astype(compute_dtype)

    # Gate-packed W_hh^T (H, L); padded columns are zero -> padded gate lanes stay exact 0.
    whh = jnp.pad(w_hh.T, ((0, 0), (0, L - 4 * H))).astype(compute_dtype)

    kernel = _make_lstm_kernel(H=H, t_chunk=t_chunk, T_total=T,
                               whole_slab=whole_slab, need_mask=need_mask,
                               unroll=unroll)

    h_last_pad = pl.pallas_call(
        kernel,
        out_shape=jax.ShapeDtypeStruct((B_pad2, H), jnp.float32),
        grid=(n_btiles, n_tchunks),
        in_specs=[
            pl.BlockSpec((t_chunk, b_tile, L), lambda b, t: (t, b, 0)),  # xg chunk
            pl.BlockSpec((H, L), lambda b, t: (0, 0)),                   # W_hh^T (resident)
        ],
        out_specs=pl.BlockSpec((b_tile, H), lambda b, t: (b, 0)),        # resident across time
        scratch_shapes=[
            pltpu.VMEM((b_tile, H), jnp.float32),   # h state
            pltpu.VMEM((b_tile, H), jnp.float32),   # c state
        ],
        compiler_params=pltpu.CompilerParams(
            dimension_semantics=("parallel", "arbitrary")),   # batch parallel, time serial
    )(xg, whh)

    # ---- FC lifted out of the serial kernel ----
    h_last = h_last_pad[:B, :]
    return h_last @ w_fc.T + b_fc


def lstm_model_reference(x, params):
    """Pure-JAX reference matching torch.nn.LSTM(batch_first=True) + Linear."""
    w_ih, w_hh, b_ih, b_hh, w_fc, b_fc = (
        params["w_ih"], params["w_hh"], params["b_ih"], params["b_hh"],
        params["w_fc"], params["b_fc"])
    B, T, _ = x.shape
    H = w_hh.shape[1]
    h = jnp.zeros((B, H), jnp.float32)
    c = jnp.zeros((B, H), jnp.float32)
    for t in range(T):
        gates = x[:, t, :] @ w_ih.T + h @ w_hh.T + b_ih + b_hh
        i = jax.nn.sigmoid(gates[:, 0 * H:1 * H])
        f = jax.nn.sigmoid(gates[:, 1 * H:2 * H])
        g = jnp.tanh(gates[:, 2 * H:3 * H])
        o = jax.nn.sigmoid(gates[:, 3 * H:4 * H])
        c = f * c + i * g
        h = o * jnp.tanh(c)
    return h @ w_fc.T + b_fc


def init_params(key, input_size, hidden_size, output_size):
    """Deterministic init mimicking PyTorch's U(-1/sqrt(H), 1/sqrt(H))."""
    ks = jax.random.split(key, 6)
    k = 1.0 / jnp.sqrt(hidden_size)
    u = lambda kk, shape: jax.random.uniform(kk, shape, jnp.float32, -k, k)
    return {
        "w_ih": u(ks[0], (4 * hidden_size, input_size)),
        "w_hh": u(ks[1], (4 * hidden_size, hidden_size)),
        "b_ih": u(ks[2], (4 * hidden_size,)),
        "b_hh": u(ks[3], (4 * hidden_size,)),
        "w_fc": u(ks[4], (output_size, hidden_size)),
        "b_fc": u(ks[5], (output_size,)),
    }


if __name__ == "__main__":
    B, T, I, H, O = 2, 8, 16, 32, 1
    key = jax.random.PRNGKey(0)
    kx, kp = jax.random.split(key)
    x = jax.random.normal(kx, (B, T, I), jnp.float32)
    params = init_params(kp, I, H, O)

    ref = lstm_model_reference(x, params)

    # f32 path with t_chunk=3 (T_pad=9): exercises cross-chunk state carry AND the
    # padded-time masking.  Tolerance 1e-4 absorbs the tanh-based sigmoid / reassociation.
    out_f32 = jax.block_until_ready(
        lstm_model_forward(x, params, t_chunk=3, compute_dtype=jnp.float32))
    assert out_f32.shape == (B, O)
    assert jnp.allclose(out_f32, ref, atol=1e-4, rtol=1e-4), \
        float(jnp.max(jnp.abs(out_f32 - ref)))

    # Default perf config: bf16 MXU operands + bf16 streamed xg (f32 accumulation).
    out_bf16 = jax.block_until_ready(lstm_model_forward(x, params))
    assert out_bf16.shape == (B, O)
    assert jnp.allclose(out_bf16, ref, atol=5e-2, rtol=5e-2), \
        float(jnp.max(jnp.abs(out_bf16 - ref)))

    print("KERNEL_OK")
</pallas_src>

<mosaic_0001>
module attributes {stable_mosaic.version = 11 : i64} {
  func.func @kernel(%arg0: i32, %arg1: i32, %arg2: memref<3x8x128xf32, #tpu.memory_space<vmem>>, %arg3: memref<32x128xf32, #tpu.memory_space<vmem>>, %arg4: memref<8x32xf32, #tpu.memory_space<vmem>>, %arg5: memref<8x32xf32, #tpu.memory_space<vmem>>, %arg6: memref<8x32xf32, #tpu.memory_space<vmem>>) attributes {dimension_semantics = [#tpu.dimension_semantics<parallel>, #tpu.dimension_semantics<arbitrary>], iteration_bounds = array<i64: 1, 3>, scalar_prefetch = 0 : i64, scratch_operands = 2 : i64, tpu.core_type = #tpu.core_type<tc>, window_params = [{transform_indices = @transform_0, window_bounds = array<i64: 3, 8, 128>}, {pipeline_mode = #tpu.pipeline_mode<synchronous>, transform_indices = @transform_1, window_bounds = array<i64: 32, 128>}, {transform_indices = @transform_2, window_bounds = array<i64: 8, 32>}]} {
    %c0_i32 = arith.constant 0 : i32
    %0 = arith.cmpi eq, %arg1, %c0_i32 : i32
    %1 = arith.extui %0 : i1 to i32
    %c0_i32_0 = arith.constant 0 : i32
    %2 = arith.cmpi ne, %1, %c0_i32_0 : i32
    scf.if %2 {
      %cst_35 = arith.constant 0.000000e+00 : f32
      %92 = vector.broadcast %cst_35 : f32 to vector<8x32xf32>
      %c0_36 = arith.constant 0 : index
      %c0_37 = arith.constant 0 : index
      %93 = vector.load %arg5[%c0_36, %c0_37] : memref<8x32xf32, #tpu.memory_space<vmem>>, vector<8x32xf32>
      tpu.vector_store %arg5[%c0_36, %c0_37], %92 {strides = array<i32>} : memref<8x32xf32, #tpu.memory_space<vmem>>, vector<8x32xf32>,
      %cst_38 = arith.constant 0.000000e+00 : f32
      %94 = vector.broadcast %cst_38 : f32 to vector<8x32xf32>
      %c0_39 = arith.constant 0 : index
      %c0_40 = arith.constant 0 : index
      %95 = vector.load %arg6[%c0_39, %c0_40] : memref<8x32xf32, #tpu.memory_space<vmem>>, vector<8x32xf32>
      tpu.vector_store %arg6[%c0_39, %c0_40], %94 {strides = array<i32>} : memref<8x32xf32, #tpu.memory_space<vmem>>, vector<8x32xf32>,
    } else {
    }
    %c0 = arith.constant 0 : index
    %c0_1 = arith.constant 0 : index
    %3 = vector.load %arg3[%c0, %c0_1] : memref<32x128xf32, #tpu.memory_space<vmem>>, vector<32x128xf32>
    %c0_2 = arith.constant 0 : index
    %c0_3 = arith.constant 0 : index
    %4 = vector.load %arg5[%c0_2, %c0_3] : memref<8x32xf32, #tpu.memory_space<vmem>>, vector<8x32xf32>
    %c0_4 = arith.constant 0 : index
    %c0_5 = arith.constant 0 : index
    %5 = vector.load %arg6[%c0_4, %c0_5] : memref<8x32xf32, #tpu.memory_space<vmem>>, vector<8x32xf32>
    %c0_i32_6 = arith.constant 0 : i32
    %6 = arith.index_cast %c0_i32_6 : i32 to index
    %c0_7 = arith.constant 0 : index
    %c0_8 = arith.constant 0 : index
    %7 = vector.load %arg2[%6, %c0_7, %c0_8] : memref<3x8x128xf32, #tpu.memory_space<vmem>>, vector<1x8x128xf32>
    %8 = vector.shape_cast %7 : vector<1x8x128xf32> to vector<8x128xf32>
    %cst = arith.constant dense<0.000000e+00> : vector<8x128xf32>
    %9 = tpu.matmul %4, %3, %cst {dimension_numbers = #tpu.dot_dimension_numbers<[1], [0], [0], [1], [0, 0, 1, 1], [], []>} : vector<8x32xf32>, vector<32x128xf32>, vector<8x128xf32> -> vector<8x128xf32>
    %10 = arith.addf %8, %9 : vector<8x128xf32>
    %cst_9 = arith.constant 5.000000e-01 : f32
    %11 = vector.broadcast %cst_9 : f32 to vector<8x128xf32>
    %12 = arith.mulf %11, %10 : vector<8x128xf32>
    %13 = math.tanh %12 : vector<8x128xf32>
    %cst_10 = arith.constant 5.000000e-01 : f32
    %14 = vector.broadcast %cst_10 : f32 to vector<8x128xf32>
    %15 = arith.mulf %14, %13 : vector<8x128xf32>
    %cst_11 = arith.constant 5.000000e-01 : f32
    %16 = vector.broadcast %cst_11 : f32 to vector<8x128xf32>
    %17 = arith.addf %15, %16 : vector<8x128xf32>
    %18 = math.tanh %10 : vector<8x128xf32>
    %19 = vector.extract_strided_slice %17 {offsets = [0, 0], sizes = [8, 32], strides = [1, 1]} : vector<8x128xf32> to vector<8x32xf32>
    %20 = vector.extract_strided_slice %17 {offsets = [0, 32], sizes = [8, 32], strides = [1, 1]} : vector<8x128xf32> to vector<8x32xf32>
    %21 = vector.extract_strided_slice %18 {offsets = [0, 64], sizes = [8, 32], strides = [1, 1]} : vector<8x128xf32> to vector<8x32xf32>
    %22 = vector.extract_strided_slice %17 {offsets = [0, 96], sizes = [8, 32], strides = [1, 1]} : vector<8x128xf32> to vector<8x32xf32>
    %23 = arith.mulf %20, %5 : vector<8x32xf32>
    %24 = arith.mulf %19, %21 : vector<8x32xf32>
    %25 = arith.addf %23, %24 : vector<8x32xf32>
    %26 = math.tanh %25 : vector<8x32xf32>
    %27 = arith.mulf %22, %26 : vector<8x32xf32>
    %c3_i32 = arith.constant 3 : i32
    %28 = arith.muli %arg1, %c3_i32 : i32
    %29 = arith.addi %28, %c0_i32_6 : i32
    %c8_i32 = arith.constant 8 : i32
    %30 = arith.cmpi slt, %29, %c8_i32 : i32
    %31 = arith.select %30, %27, %4 : vector<8x32xf32>
    %32 = arith.select %30, %25, %5 : vector<8x32xf32>
    %c1_i32 = arith.constant 1 : i32
    %33 = arith.index_cast %c1_i32 : i32 to index
    %c0_12 = arith.constant 0 : index
    %c0_13 = arith.constant 0 : index
    %34 = vector.load %arg2[%33, %c0_12, %c0_13] : memref<3x8x128xf32, #tpu.memory_space<vmem>>, vector<1x8x128xf32>
    %35 = vector.shape_cast %34 : vector<1x8x128xf32> to vector<8x128xf32>
    %cst_14 = arith.constant dense<0.000000e+00> : vector<8x128xf32>
    %36 = tpu.matmul %31, %3, %cst_14 {dimension_numbers = #tpu.dot_dimension_numbers<[1], [0], [0], [1], [0, 0, 1, 1], [], []>} : vector<8x32xf32>, vector<32x128xf32>, vector<8x128xf32> -> vector<8x128xf32>
    %37 = arith.addf %35, %36 : vector<8x128xf32>
    %cst_15 = arith.constant 5.000000e-01 : f32
    %38 = vector.broadcast %cst_15 : f32 to vector<8x128xf32>
    %39 = arith.mulf %38, %37 : vector<8x128xf32>
    %40 = math.tanh %39 : vector<8x128xf32>
    %cst_16 = arith.constant 5.000000e-01 : f32
    %41 = vector.broadcast %cst_16 : f32 to vector<8x128xf32>
    %42 = arith.mulf %41, %40 : vector<8x128xf32>
    %cst_17 = arith.constant 5.000000e-01 : f32
    %43 = vector.broadcast %cst_17 : f32 to vector<8x128xf32>
    %44 = arith.addf %42, %43 : vector<8x128xf32>
    %45 = math.tanh %37 : vector<8x128xf32>
    %46 = vector.extract_strided_slice %44 {offsets = [0, 0], sizes = [8, 32], strides = [1, 1]} : vector<8x128xf32> to vector<8x32xf32>
    %47 = vector.extract_strided_slice %44 {offsets = [0, 32], sizes = [8, 32], strides = [1, 1]} : vector<8x128xf32> to vector<8x32xf32>
    %48 = vector.extract_strided_slice %45 {offsets = [0, 64], sizes = [8, 32], strides = [1, 1]} : vector<8x128xf32> to vector<8x32xf32>
    %49 = vector.extract_strided_slice %44 {offsets = [0, 96], sizes = [8, 32], strides = [1, 1]} : vector<8x128xf32> to vector<8x32xf32>
    %50 = arith.mulf %47, %32 : vector<8x32xf32>
    %51 = arith.mulf %46, %48 : vector<8x32xf32>
    %52 = arith.addf %50, %51 : vector<8x32xf32>
    %53 = math.tanh %52 : vector<8x32xf32>
    %54 = arith.mulf %49, %53 : vector<8x32xf32>
    %c3_i32_18 = arith.constant 3 : i32
    %55 = arith.muli %arg1, %c3_i32_18 : i32
    %56 = arith.addi %55, %c1_i32 : i32
    %c8_i32_19 = arith.constant 8 : i32
    %57 = arith.cmpi slt, %56, %c8_i32_19 : i32
    %58 = arith.select %57, %54, %31 : vector<8x32xf32>
    %59 = arith.select %57, %52, %32 : vector<8x32xf32>
    %c2_i32 = arith.constant 2 : i32
    %60 = arith.index_cast %c2_i32 : i32 to index
    %c0_20 = arith.constant 0 : index
    %c0_21 = arith.constant 0 : index
    %61 = vector.load %arg2[%60, %c0_20, %c0_21] : memref<3x8x128xf32, #tpu.memory_space<vmem>>, vector<1x8x128xf32>
    %62 = vector.shape_cast %61 : vector<1x8x128xf32> to vector<8x128xf32>
    %cst_22 = arith.constant dense<0.000000e+00> : vector<8x128xf32>
    %63 = tpu.matmul %58, %3, %cst_22 {dimension_numbers = #tpu.dot_dimension_numbers<[1], [0], [0], [1], [0, 0, 1, 1], [], []>} : vector<8x32xf32>, vector<32x128xf32>, vector<8x128xf32> -> vector<8x128xf32>
    %64 = arith.addf %62, %63 : vector<8x128xf32>
    %cst_23 = arith.constant 5.000000e-01 : f32
    %65 = vector.broadcast %cst_23 : f32 to vector<8x128xf32>
    %66 = arith.mulf %65, %64 : vector<8x128xf32>
    %67 = math.tanh %66 : vector<8x128xf32>
    %cst_24 = arith.constant 5.000000e-01 : f32
    %68 = vector.broadcast %cst_24 : f32 to vector<8x128xf32>
    %69 = arith.mulf %68, %67 : vector<8x128xf32>
    %cst_25 = arith.constant 5.000000e-01 : f32
    %70 = vector.broadcast %cst_25 : f32 to vector<8x128xf32>
    %71 = arith.addf %69, %70 : vector<8x128xf32>
    %72 = math.tanh %64 : vector<8x128xf32>
    %73 = vector.extract_strided_slice %71 {offsets = [0, 0], sizes = [8, 32], strides = [1, 1]} : vector<8x128xf32> to vector<8x32xf32>
    %74 = vector.extract_strided_slice %71 {offsets = [0, 32], sizes = [8, 32], strides = [1, 1]} : vector<8x128xf32> to vector<8x32xf32>
    %75 = vector.extract_strided_slice %72 {offsets = [0, 64], sizes = [8, 32], strides = [1, 1]} : vector<8x128xf32> to vector<8x32xf32>
    %76 = vector.extract_strided_slice %71 {offsets = [0, 96], sizes = [8, 32], strides = [1, 1]} : vector<8x128xf32> to vector<8x32xf32>
    %77 = arith.mulf %74, %59 : vector<8x32xf32>
    %78 = arith.mulf %73, %75 : vector<8x32xf32>
    %79 = arith.addf %77, %78 : vector<8x32xf32>
    %80 = math.tanh %79 : vector<8x32xf32>
    %81 = arith.mulf %76, %80 : vector<8x32xf32>
    %c3_i32_26 = arith.constant 3 : i32
    %82 = arith.muli %arg1, %c3_i32_26 : i32
    %83 = arith.addi %82, %c2_i32 : i32
    %c8_i32_27 = arith.constant 8 : i32
    %84 = arith.cmpi slt, %83, %c8_i32_27 : i32
    %85 = arith.select %84, %81, %58 : vector<8x32xf32>
    %86 = arith.select %84, %79, %59 : vector<8x32xf32>
    %c3_i32_28 = arith.constant 3 : i32
    %c0_29 = arith.constant 0 : index
    %c0_30 = arith.constant 0 : index
    %87 = vector.load %arg5[%c0_29, %c0_30] : memref<8x32xf32, #tpu.memory_space<vmem>>, vector<8x32xf32>
    tpu.vector_store %arg5[%c0_29, %c0_30], %85 {strides = array<i32>} : memref<8x32xf32, #tpu.memory_space<vmem>>, vector<8x32xf32>,
    %c0_31 = arith.constant 0 : index
    %c0_32 = arith.constant 0 : index
    %88 = vector.load %arg6[%c0_31, %c0_32] : memref<8x32xf32, #tpu.memory_space<vmem>>, vector<8x32xf32>
    tpu.vector_store %arg6[%c0_31, %c0_32], %86 {strides = array<i32>} : memref<8x32xf32, #tpu.memory_space<vmem>>, vector<8x32xf32>,
    %c2_i32_33 = arith.constant 2 : i32
    %89 = arith.cmpi eq, %arg1, %c2_i32_33 : i32
    %90 = arith.extui %89 : i1 to i32
    %c0_i32_34 = arith.constant 0 : i32
    %91 = arith.cmpi ne, %90, %c0_i32_34 : i32
    scf.if %91 {
      %c0_35 = arith.constant 0 : index
      %c0_36 = arith.constant 0 : index
      %92 = vector.load %arg4[%c0_35, %c0_36] : memref<8x32xf32, #tpu.memory_space<vmem>>, vector<8x32xf32>
      tpu.vector_store %arg4[%c0_35, %c0_36], %85 {strides = array<i32>} : memref<8x32xf32, #tpu.memory_space<vmem>>, vector<8x32xf32>,
    } else {
    }
    return
  }
  func.func @transform_0(%arg0: i32, %arg1: i32) -> (i32, i32, i32) {
    %c0_i32 = arith.constant 0 : i32
    %c0_i32_0 = arith.constant 0 : i32
    return %arg1, %arg0, %c0_i32 : i32, i32, i32
  }
  func.func @transform_1(%arg0: i32, %arg1: i32) -> (i32, i32) {
    %c0_i32 = arith.constant 0 : i32
    %c0_i32_0 = arith.constant 0 : i32
    %c0_i32_1 = arith.constant 0 : i32
    return %c0_i32, %c0_i32_0 : i32, i32
  }
  func.func @transform_2(%arg0: i32, %arg1: i32) -> (i32, i32) {
    %c0_i32 = arith.constant 0 : i32
    %c0_i32_0 = arith.constant 0 : i32
    return %arg0, %c0_i32 : i32, i32
  }
}

</mosaic_0001>

<bundles_post_ra>
// kernel: tpu_custom_call.1
= control target key start
LH: loop header
LB: loop body
LE: loop exit
PB: predicated region body
PF: predicated region fallthrough
CT: control target
= control target key end

     0   :  { %7 = vsyncpa [#allocation5], 0  ;;  %s1216_s0 = inlined_call_operand.hbm [shape: f32[9,8,128], index: 0, kind: input, shape index: {}]   ;;  %s1217_s1 = inlined_call_operand.hbm [shape: f32[32,128], index: 1, kind: input, shape index: {}]   ;;  %s1218_s2 = inlined_call_operand.hbm [shape: f32[8,32], index: 2, kind: output, shape index: {}]  }
   0x1   :  { %9 = vsyncpa [#allocation5 + $0x1], 0 }
   0x2   :  { %10 = vsyncpa [#allocation8], 0 }
   0x3   :  { %11 = vsyncpa [#allocation6], 0  ;;  %s980_s9 = smov 0   ;;  %s982_s10 = smov 0  }
   0x4   :  { %s984_s11 = smov 0   ;;  %s986_s12 = smov 0  }
   0x5   :  { %s988_s13 = smov 0   ;;  %s990_s14 = smov 0  }
   0x6 LB: > { %s622_s15 = sadd.s32 4294967295, %s951_s14   ;;  %p51_p0 = scmp.ne.s32.totalorder %s935_s10, %s931_s9  ;;  %s951_s14 = sphi %s990_s14, %s17_s14   ;;  %s947_s13 = sphi %s988_s13, %s1238_s13   ;;  %s943_s12 = sphi %s986_s12, %s1237_s12   ;;  %s939_s11 = sphi %s984_s11, %s1236_s11   ;;  %s935_s10 = sphi %s982_s10, %s1235_s10   ;;  %s931_s9 = sphi %s980_s9, %s1234_s9  }
   0x7   : > { %p1012_p1 = scmp.eq.s32.totalorder %s622_s15, 0  ;;  %p623_p2 = scmp.ge.s32.totalorder %s951_s14, 1 }
   0x8   : > { %p109_p3 = scmp.lt.s32.totalorder %s951_s14, 4  ;;  %s953_s19 = smov [#allocation7]  }
   0x9   : > { %s1223_s16 = scalar_select %p1012_p1, 1, 0 }
   0xa   : > { %p1020_p4 = por %p1012_p1, %p51_p0  ;;  %p1024_p5 = pnand %p623_p2, %p109_p3 }
   0xb   : > { %s121_s20 = sshll.u32 %s953_s19, 4  ;;  %s26_s22 = sadd.s32 1, %s947_s13  ;;  %s122_s20 = int_to_ptr.vmem [resolvable:$true] %s121_s20 }
   0xc   : > { %s1224_s17 = scalar_select %p1020_p4, 1, 0 }
   0xd   : > { %s1225_s18 = scalar_select %p1024_p5, 1, 0 }
   0xe   : > { %p719_p6 = pneg %p1024_p5  ;;  %s809_s25 = scalar_lea.hbm %s1217_s1, 512 }
   0xf   : > { %p810_p8 = scmp.ne.s32.totalorder %s1217_s1, %s809_s25  ;;  %p816_p12 = scmp.lt.u32.totalorder %s809_s25, %s1217_s1 }
  0x10   : > { %p1032_p7 = pnand %p719_p6, %p1012_p1 }
  0x12   : > { %p811_p9 = pneg %p1032_p7 }
  0x14   : > { %p812_p10 = pnand %p811_p9, %p810_p8 }
  0x16   : > { %p813_p11 = pneg %p812_p10 }
  0x18   : > { %p818_p13 = pnand %p816_p12, %p813_p11 }
  0x1a   : > { %821 = shalt.err (!%p818_p13)
}
  0x1b   : > { %s822_s30 = scalar_lea.vmem %s122_s20, 512  ;;  %p830_p6 = scmp.lt.s32.totalorder %s122_s20, %s122_s20 }
  0x1c   : > { %p823_p0 = scmp.ne.s32.totalorder %s122_s20, %s822_s30  ;;  %p831_p1 = scmp.lt.s32.totalorder %s822_s30, %s822_s30 }
  0x1e   : > { %p825_p2 = pnand %p823_p0, %p811_p9  ;;  %p832_p4 = por %p831_p1, %p830_p6 }
  0x20   : > { %p826_p3 = pneg %p825_p2 }
  0x22   : > { %p833_p5 = pnand %p832_p4, %p826_p3 }
  0x24   : > { %836 = shalt.err (!%p833_p5)
}
  0x25   : > { %s954_s3 = smov 128   ;;  %s955_s4 = smov 8  }
  0x26   : > { %722 = dma.hbm_to_vmem [thread:$0]  (!%p1032_p7), %s1217_s1, 512, %s122_s20, [#allocation8], %s954_s3, %s954_s3, %s955_s4  }
  0x27   : > { %p27_p1 = scmp.ge.s32.totalorder %s26_s22, 3  ;;  %s38_s7 = sadd.s32 1, %s939_s11 }
  0x28   : > { %p45_p4 = scmp.ne.s32.totalorder %s939_s11, %s935_s10  ;;  %p46_p5 = scmp.eq.s32.totalorder %s951_s14, 0 }
  0x29   : > { %s1240_s22 = smov (%p27_p1, %s26_s22), 0  ;;  %p728_p9 = scmp.lt.s32.totalorder %s951_s14, 3 }
  0x2a   : > { %p47_p8 = por %p46_p5, %p45_p4  ;;  %s33_s8 = ssub.s32 %s947_s13, %s1240_s22 }
  0x2b   : > { %s135_s9 = sand.u32 1, %s939_s11   ;;  %p36_p10 = scmp.eq.s32.totalorder %s33_s8, 0 }
  0x2c   : > { %s707_s19 = smul.u32 24, %s135_s9  ;;  %p1066_p11 = pnand %p728_p9, %p47_p8 }
  0x2d   : > { %s1071_s20 = scalar_select %p36_p10, %s939_s11, %s38_s7  }
  0x2e   : > { %s640_s23 = smul.u32 384, %s947_s13  ;;  %s139_s24 = scalar_lea.vmem [#allocation4], %s707_s19 }
  0x2f   : > { %s147_s25 = sshll.u32 %s139_s24, 4  ;;  %s1081_s29 = scalar_lea.sflag [#allocation5], %s135_s9  ;;  %s1079_s25 = int_to_ptr.vmem [resolvable:$true] %s147_s25 }
  0x30   : > { %s1077_s28 = scalar_lea.hbm %s1216_s0, %s640_s23  ;;  %p839_p12 = pneg %p1066_p11 }
  0x31   : > { %s837_s30 = scalar_lea.hbm %s1077_s28, 384  ;;  %s842_s7 = scalar_lea.hbm %s1216_s0, 1152 }
  0x32   : > { %p838_p7 = scmp.ne.s32.totalorder %s1077_s28, %s837_s30  ;;  %p843_p2 = scmp.lt.u32.totalorder %s1077_s28, %s1216_s0 }
  0x33   : > { %p844_p3 = scmp.lt.u32.totalorder %s842_s7, %s837_s30  ;;  %p846_p1 = scmp.lt.u32.totalorder %s837_s30, %s1077_s28 }
  0x34   : > { %p840_p13 = pnand %p839_p12, %p838_p7 }
  0x35   : > { %p845_p6 = por %p844_p3, %p843_p2 }
  0x36   : > { %p841_p0 = pneg %p840_p13 }
  0x37   : > { %p847_p4 = por %p846_p1, %p845_p6 }
  0x39   : > { %p848_p5 = pnand %p847_p4, %p841_p0 }
  0x3b   : > { %851 = shalt.err (!%p848_p5)
}
  0x3c   : > { %s852_s9 = scalar_lea.vmem %s1079_s25, 384  ;;  %s956_s23 = smov [#allocation4]  }
  0x3d   : > { %p853_p8 = scmp.ne.s32.totalorder %s1079_s25, %s852_s9  ;;  %s857_s24 = sshll.u32 %s956_s23, 4  ;;  %s858_s24 = int_to_ptr.vmem [resolvable:$false] %s857_s24 }
  0x3e   : > { %s859_s26 = scalar_lea.vmem %s858_s24, 768  ;;  %p860_p7 = scmp.lt.s32.totalorder %s1079_s25, %s858_s24 }
  0x3f   : > { %p855_p9 = pnand %p853_p8, %p839_p12  ;;  %p861_p13 = scmp.lt.s32.totalorder %s859_s26, %s852_s9 }
  0x41   : > { %p856_p10 = pneg %p855_p9  ;;  %p862_p2 = por %p861_p13, %p860_p7 }
  0x43   : > { %p863_p3 = pnand %p862_p2, %p856_p10 }
  0x45   : > { %866 = shalt.err (!%p863_p3)
}
  0x46   : > { %726 = dma.hbm_to_vmem [thread:$0]  (!%p1066_p11), %s1077_s28, 384, %s1079_s25, %s1081_s29, %s954_s3, %s954_s3, %s955_s4  }
  0x47   : > { %p1228_p12 = scmp.ne.s32.totalorder %s1225_s18, 0 }
  0x48   : > { %s161_s27 = sand.u32 (!%p1228_p12), 1, %s935_s10   ;;  %p1229_p0 = scmp.ne.s32.totalorder (!%p1228_p12), %s1224_s17, 0 }
  0x49   : > { %159 = sbr.rel (%p1228_p12) target bundleno = 2238 (0x8be), region = 28  ;;  %s162_s5 = scalar_lea.sflag (!%p1228_p12), [#allocation5], %s161_s27 }
  0x4a   : > { %s708_s30 = smul.u32 (!%p1228_p12), 24, %s161_s27 }
  0x4c   : > { %s1115_s6 = scalar_lea.vmem (!%p1228_p12), [#allocation4], %s708_s30 }
  0x50   : > { %918 = dma.done.wait (%p1229_p0), %s162_s5, 384  }
  0x51   : > { %920 = vsyncadd (%p1229_p0), %s162_s5, 4294966912  ;;  %p1230_p6 = scmp.ne.s32.totalorder %s1223_s16, 0 }
  0x53   : > { %922 = dma.done.wait (%p1230_p6), [#allocation8], 512  }
  0x54   : > { %924 = vsyncadd (%p1230_p6), [#allocation8], 4294966784  ;;  %p629_p11 = scmp.ne.s32.totalorder %s943_s12, 0 }
  0x55   : > { %vm190_vm0 = vcmask (!%p629_p11), 261120   ;;  %v957_v0 = vmov (!%p629_p11), 0.0  }
  0x56   : > { %189 = sbr.rel (%p629_p11) target bundleno = 93 (0x5d), region = 40  ;;  %191 = vst.msk [vmem:[#allocation2] sm:$0xff] (!%p629_p11), %vm190_vm0, %v957_v0  ;;  %192 = vst.msk [vmem:[#allocation3] sm:$0xff] (!%p629_p11), %vm190_vm0, %v957_v0 }
  0x5d PF: > { %v193_v1 = vld [vmem:[#allocation7] sm:$0xff]  ;;  %v194_v2 = vld [vmem:[#allocation7 + $0x8] sm:$0xff]  ;;  %v195_v3 = vld [vmem:[#allocation7 + $0x10] sm:$0xff]  ;;  %v958_v4 = vmov 0.0|0.0   ;;  %vm959_vm1 = vmmov 0   ;;  %v960_v7 = vmov 0.0  }
  0x5e   : > { %689 = vmatprep.subr.bf16.mxu0 %v958_v4  ;;  %v690_v5 = vpack.c.bf16 %v194_v2, %v193_v1  ;;  %v196_v6 = vld [vmem:[#allocation7 + $0x18] sm:$0xff]  ;;  %664 = vmatprep.mubr.msk.f32.mxu0 %vm959_vm1, %v960_v7  ;;  %v197_v9 = vld [vmem:[#allocation2] sm:$0xff]  ;;  %vm200_vm2 = vcmask 261120   ;;  %v199_v10 = vld [vmem:[%s1115_s6] sm:$0xff]  ;;  %s961_s16 = smov 64   ;;  %s962_s17 = smov 32  }
  0x5f   : > { %695 = vmatprep.subr.bf16.mxu1 %v958_v4  ;;  %675 = vmatprep.mubr.msk.f32.mxu1 %vm959_vm1, %v960_v7  ;;  %v693_v8 = vpack.c.bf16 %v196_v6, %v195_v3  ;;  %v198_v15 = vld [vmem:[#allocation3] sm:$0xff]  ;;  %s963_s18 = smov 96   ;;  %s1137_s3 = smul.u32 3, %s943_s12  ;;  %v631_v34 = vld [vmem:[%s1115_s6 + $0x8] sm:$0xff]  ;;  %v633_v55 = vld [vmem:[%s1115_s6 + $0x10] sm:$0xff] }
  0x60   : > { %691 = vmatpush3.bf16.msra.mxu0 %v690_v5  ;;  %697 = vmatpush3.bf16.msra.mxu1 %v690_v5  ;;  %p635_p8 = scmp.ne.s32.totalorder %s943_s12, 2 }
  0x61   : > { %692 = vmatprep.subr.bf16.mxu0 %v958_v4  ;;  %698 = vmatprep.subr.bf16.mxu1 %v958_v4  ;;  %p302_p1 = scmp.lt.s32.totalorder %s1137_s3, 8  ;;  %s411_s21 = sadd.s32 1, %s1137_s3 }
  0x62   : > { %p412_p4 = scmp.lt.s32.totalorder %s411_s21, 8  ;;  %s518_s28 = sadd.s32 2, %s1137_s3 }
  0x63   : > { %s303_s4 = scalar_select %p302_p1, 1, 0 }
  0x64   : > { %694 = vmatpush3.bf16.msra.mxu0 %v693_v8  ;;  %700 = vmatpush3.bf16.msra.mxu1 %v693_v8  ;;  %s413_s25 = scalar_select %p412_p4, 1, 0 }
  0x65   : > { %701 = vmatprep.subr.bf16.mxu0 %v958_v4  ;;  %v304_v27 = vstv %s303_s4  ;;  %p519_p5 = scmp.lt.s32.totalorder %s518_s28, 8 }
  0x66   : > { %vm1140_vm3 = vcmp.eq.s32.totalorder %v304_v27, 1  ;;  %v414_v50 = vstv %s413_s25 }
  0x67   : > { %665 = vmatmul.mubr.msk.f32.vlgmr.msra.gmra.mrb[0].mxu0 %vm200_vm2, %v197_v9  ;;  %vm415_vm4 = vcmp.eq.s32.totalorder %v414_v50, 1  ;;  %s520_s29 = scalar_select %p519_p5, 1, 0 }
  0x68   : > { %703 = vmatpush3.bf16.msra.mxu0 %v690_v5  ;;  %686 = vmatprep.mubr.msk.f32.mxu0 %vm959_vm1, %v960_v7 }
  0x69   : > { %704 = vmatprep.subr.bf16.mxu0 %v958_v4  ;;  %v521_v6 = vstv %s520_s29 }
  0x6a   : > { %vm522_vm5 = vcmp.eq.s32.totalorder %v521_v6, 1 }
  0x6c   : > { %706 = vmatpush3.bf16.msra.mxu0 %v693_v8 }
 0x13a   : > { %v270_v11 = vpop.f32.mrb[0].mxu0 }
 0x13b   : > { %v274_v12 = vadd.f32 %v270_v11, %v199_v10  ;;  %v666_v13 = vpop.f32.mrb[1].mxu0 }
 0x13d   : > { %791 = vtanh.f32 %v274_v12  ;;  %v275_v16 = vmul.f32 0.5, %v274_v12 }
 0x13f   : > { %793 = vtanh.f32 %v275_v16 }
 0x147   : > { %v792_v14 = vpop.eup %791 }
 0x148   : > { %286 = vrot.lane.b32.xlu0 %v792_v14, %s961_s16 }
 0x149   : > { %v794_v17 = vpop.eup %793 }
 0x14a   : > { %v277_v18 = vmul.f32 0.5, %v794_v17 }
 0x14c   : > { %281 = vrot.lane.b32.xlu0 %v198_v15, %s962_s17  ;;  %v278_v19 = vadd.f32 0.5, %v277_v18 }
 0x150   : > { %306 = vrot.lane.b32.xlu0 %v197_v9, %s963_s18 }
 0x1ba   : > { %v287_v20 = vpop.permute.xlu0 %286 }
 0x1bb   : > { %v289_v21 = vmul.f32 %v287_v20, %v278_v19 }
 0x1bd   : > { %291 = vrot.lane.b32.xlu1 %v289_v21, %s962_s17 }
 0x1be   : > { %v282_v22 = vpop.permute.xlu0 %281 }
 0x1bf   : > { %v284_v23 = vmul.f32 %v282_v22, %v278_v19 }
 0x1c2   : > { %v307_v29 = vpop.permute.xlu0 %306 }
 0x22f   : > { %v292_v24 = vpop.permute.xlu1 %291 }
 0x230   : > { %v294_v25 = vadd.f32 %v292_v24, %v284_v23 }
 0x232   : > { %795 = vtanh.f32 %v294_v25  ;;  %v310_v45 = vsel %vm1140_vm3, %v294_v25, %v282_v22 }
 0x23c   : > { %v796_v26 = vpop.eup %795 }
 0x23d   : > { %297 = vrot.lane.b32.xlu1 %v796_v26, %s961_s16 }
 0x2af   : > { %v298_v28 = vpop.permute.xlu1 %297 }
 0x2b0   : > { %v300_v30 = vmul.f32 %v298_v28, %v278_v19 }
 0x2b2   : > { %v309_v32 = vsel %vm1140_vm3, %v300_v30, %v307_v29 }
 0x2b3   : > { %314 = vrot.lane.b32.xlu1 %v309_v32, %s962_s17 }
 0x325   : > { %v315_v33 = vpop.permute.xlu1 %314 }
 0x326   : > { %676 = vmatmul.mubr.msk.f32.vlgmr.msra.gmra.mrb[0].mxu1 %vm200_vm2, %v315_v33 }
 0x3f9   : > { %v384_v35 = vpop.f32.mrb[0].mxu1 }
 0x3fa   : > { %v388_v36 = vadd.f32 %v631_v34, %v384_v35  ;;  %v677_v37 = vpop.f32.mrb[1].mxu1 }
 0x3fc   : > { %797 = vtanh.f32 %v388_v36  ;;  %v389_v39 = vmul.f32 0.5, %v388_v36 }
 0x3fe   : > { %799 = vtanh.f32 %v389_v39 }
 0x406   : > { %v798_v38 = vpop.eup %797 }
 0x407   : > { %396 = vrot.lane.b32.xlu0 %v798_v38, %s961_s16 }
 0x408   : > { %v800_v40 = vpop.eup %799 }
 0x409   : > { %v391_v41 = vmul.f32 0.5, %v800_v40 }
 0x40b   : > { %v392_v42 = vadd.f32 0.5, %v391_v41 }
 0x40d   : > { %v394_v46 = vmul.f32 %v392_v42, %v310_v45 }
 0x479   : > { %v397_v43 = vpop.permute.xlu0 %396 }
 0x47a   : > { %v399_v44 = vmul.f32 %v397_v43, %v392_v42 }
 0x47c   : > { %401 = vrot.lane.b32.xlu1 %v399_v44, %s962_s17 }
 0x4ee   : > { %v402_v47 = vpop.permute.xlu1 %401 }
 0x4ef   : > { %v404_v48 = vadd.f32 %v402_v47, %v394_v46 }
 0x4f1   : > { %801 = vtanh.f32 %v404_v48  ;;  %v417_v2 = vsel %vm415_vm4, %v404_v48, %v310_v45 }
 0x4fb   : > { %v802_v49 = vpop.eup %801 }
 0x4fc   : > { %407 = vrot.lane.b32.xlu0 %v802_v49, %s961_s16 }
 0x56e   : > { %v408_v51 = vpop.permute.xlu0 %407 }
 0x56f   : > { %v410_v52 = vmul.f32 %v408_v51, %v392_v42 }
 0x571   : > { %v416_v53 = vsel %vm415_vm4, %v410_v52, %v309_v32 }
 0x572   : > { %421 = vrot.lane.b32.xlu1 %v416_v53, %s962_s17 }
 0x5e4   : > { %v422_v54 = vpop.permute.xlu1 %421 }
 0x5e5   : > { %687 = vmatmul.mubr.msk.f32.vlgmr.msra.gmra.mrb[2].mxu0 %vm200_vm2, %v422_v54 }
 0x6b8   : > { %v491_v56 = vpop.f32.mrb[2].mxu0 }
 0x6b9   : > { %v495_v57 = vadd.f32 %v633_v55, %v491_v56  ;;  %v688_v58 = vpop.f32.mrb[3].mxu0 }
 0x6bb   : > { %803 = vtanh.f32 %v495_v57  ;;  %v496_v60 = vmul.f32 0.5, %v495_v57 }
 0x6bd   : > { %805 = vtanh.f32 %v496_v60 }
 0x6c5   : > { %v804_v59 = vpop.eup %803 }
 0x6c6   : > { %503 = vrot.lane.b32.xlu0 %v804_v59, %s961_s16 }
 0x6c7   : > { %v806_v61 = vpop.eup %805 }
 0x6c8   : > { %v498_v62 = vmul.f32 0.5, %v806_v61 }
 0x6ca   : > { %v499_v63 = vadd.f32 0.5, %v498_v62 }
 0x6cc   : > { %v501_v3 = vmul.f32 %v499_v63, %v417_v2 }
 0x738   : > { %v504_v0 = vpop.permute.xlu0 %503 }
 0x739   : > { %v506_v1 = vmul.f32 %v504_v0, %v499_v63 }
 0x73b   : > { %508 = vrot.lane.b32.xlu1 %v506_v1, %s962_s17 }
 0x7ad   : > { %v509_v4 = vpop.permute.xlu1 %508 }
 0x7ae   : > { %v511_v5 = vadd.f32 %v509_v4, %v501_v3 }
 0x7b0   : > { %807 = vtanh.f32 %v511_v5  ;;  %v524_v8 = vsel %vm522_vm5, %v511_v5, %v417_v2 }
 0x7ba   : > { %v808_v7 = vpop.eup %807 }
 0x7bb   : > { %514 = vrot.lane.b32.xlu0 %v808_v7, %s961_s16 }
 0x7bf   : > { %531 = vrot.lane.b32.xlu0 %v524_v8, %s963_s18 }
 0x82d   : > { %v515_v9 = vpop.permute.xlu0 %514 }
 0x82e   : > { %v517_v10 = vmul.f32 %v515_v9, %v499_v63 }
 0x830   : > { %v523_v11 = vsel %vm522_vm5, %v517_v10, %v416_v53 }
 0x831   : > { %526 = vrot.lane.b32.xlu1 %v523_v11, %s962_s17  ;;  %v532_v12 = vpop.permute.xlu0 %531 }
 0x832   : > { %534 = vst.msk [vmem:[#allocation3] sm:$0xff] %vm200_vm2, %v532_v12 }
 0x89e   : > { %538 = sbr.rel (%p635_p8) target bundleno = 2213 (0x8a5), region = 44 }
 0x8a3   : > { %v527_v13 = vpop.permute.xlu1 %526 }
 0x8a4   : > { %529 = vst.msk [vmem:[#allocation2] sm:$0xff] %vm200_vm2, %v527_v13  ;;  %539 = vst.msk [vmem:[#allocation9] sm:$0xff] (!%p635_p8), %vm200_vm2, %v527_v13 }
 0x8a5 PF: > { %p1172_p9 = scmp.eq.s32.totalorder %s622_s15, 2  ;;  %s964_s8 = smov [#allocation9]  }
 0x8a6   : > { %s549_s19 = sshll.u32 %s964_s8, 4  ;;  %s550_s19 = int_to_ptr.vmem [resolvable:$true] %s549_s19 }
 0x8a7   : > { %s867_s9 = scalar_lea.vmem %s550_s19, 128  ;;  %p874_p2 = scmp.lt.s32.totalorder %s550_s19, %s550_s19 }
 0x8a8   : > { %p868_p10 = scmp.ne.s32.totalorder %s550_s19, %s867_s9  ;;  %p875_p3 = scmp.lt.s32.totalorder %s867_s9, %s867_s9 }
 0x8aa   : > { %p869_p7 = pnand %p868_p10, %p1172_p9  ;;  %p876_p12 = por %p875_p3, %p874_p2 }
 0x8ac   : > { %p870_p13 = pneg %p869_p7 }
 0x8ae   : > { %p877_p0 = pnand %p876_p12, %p870_p13 }
 0x8b0   : > { %880 = shalt.err (!%p877_p0)
}
 0x8b1   : > { %s881_s15 = scalar_lea.hbm %s1218_s2, 128 }
 0x8b2   : > { %p882_p6 = scmp.ne.s32.totalorder %s1218_s2, %s881_s15  ;;  %p887_p4 = scmp.lt.u32.totalorder %s881_s15, %s1218_s2 }
 0x8b4   : > { %p883_p11 = pnand %p882_p6, %p1172_p9 }
 0x8b6   : > { %p884_p1 = pneg %p883_p11 }
 0x8b8   : > { %p889_p5 = pnand %p887_p4, %p884_p1 }
 0x8ba   : > { %892 = shalt.err (!%p889_p5)
}
 0x8bb   : > { %716 = dma.vmem_to_hbm [thread:$0]  (%p1172_p9), %s550_s19, 128, %s1218_s2, [#allocation6]  }
 0x8bc   : > { %926 = dma.done.wait (%p1172_p9), [#allocation6], 128  }
 0x8bd   : > { %928 = vsyncadd (%p1172_p9), [#allocation6], 4294967168 }
 0x8be PF: > { %s17_s14 = sadd.s32 1, %s951_s14   ;;  %s1234_s9 = smov %s935_s10 }
 0x8bf   : > { %p14_p8 = scmp.ge.s32.totalorder %s17_s14, 5   ;;  %s1235_s10 = smov %s939_s11 }
 0x8c0   : > { %s1236_s11 = smov %s1071_s20  ;;  %s1237_s12 = smov %s947_s13 }
 0x8c1   : > { %s1238_s13 = smov %s1240_s22  ;;  %16 = sbr.rel (!%p14_p8) target bundleno = 6 (0x6), region = 80 }
 0x8c8   :  { %562 = vsyncpa [#allocation5], 1 }
 0x8c9   :  { %564 = vsyncpa [#allocation5 + $0x1], 1 }
 0x8ca   :  { %565 = vsyncpa [#allocation8], 1 }
 0x8cb   :  { %566 = vsyncpa [#allocation6], 1 }
 0x8cc   :  { %568 = vsyncpa [#allocation6 + $0x1], 1 }

</bundles_post_ra>
